<compile_context>
chip_gen: v7x
topology: tpu7x:2x2x1
jax: 0.10.0
libtpu: 0.0.40
codegen_flags: <defaults>
</compile_context>

<pallas_src>
import functools

import jax
import jax.numpy as jnp
from jax.experimental import pallas as pl
from jax.experimental.pallas import tpu as pltpu


# ----------------------------------------------------------------------------
# Fused Pallas kernel: 4 x (bf16 GEMM -> f32 acc, +bias, ReLU)
# ----------------------------------------------------------------------------
def _fused_mlp_kernel(x_ref,
                      w1_ref, b1_ref,
                      w2_ref, b2_ref,
                      w3_ref, b3_ref,
                      w4_ref, b4_ref,
                      o_ref, *, compute_dtype):
    layers = ((w1_ref, b1_ref), (w2_ref, b2_ref),
              (w3_ref, b3_ref), (w4_ref, b4_ref))
    h = x_ref[...]                                   # compute_dtype (bf16)
    for idx, (w_ref, b_ref) in enumerate(layers):    # unrolled at trace time
        acc = jnp.dot(h, w_ref[...], preferred_element_type=jnp.float32)
        acc = jnp.maximum(acc + b_ref[...], 0.0)     # folded BN+bias, ReLU (f32)
        if idx + 1 < len(layers):
            h = acc.astype(compute_dtype)            # feed next MXU in bf16
        else:
            h = acc
    o_ref[...] = h.astype(o_ref.dtype)


# ----------------------------------------------------------------------------
# One-time parameter folding (outside the per-call jitted path)
# ----------------------------------------------------------------------------
def prepare_params(params, *, eps=1e-5, compute_dtype=jnp.bfloat16):
    """Fold Linear bias + eval-mode BatchNorm1d into (w_folded, bias) pairs."""
    folded = []
    for name in ("fc1", "fc2", "fc3", "fc_out"):
        p = params[name]
        scale = p["gamma"] / jnp.sqrt(p["var"] + eps)           # (N,)
        w = (p["w"] * scale[None, :]).astype(compute_dtype)      # (K, N) bf16
        b = ((p["b"] - p["mean"]) * scale + p["beta"]).astype(jnp.float32)
        folded.append((w, b.reshape(1, -1)))
    return tuple(folded)


# ----------------------------------------------------------------------------
# Wrapper: whole MLP in one pallas_call
# ----------------------------------------------------------------------------
def baseline_forward(folded, x, *, tm=1024):
    """x: (M, 512) -> logits (M, no_class)."""
    compute_dtype = folded[0][0].dtype
    x = x.astype(compute_dtype)
    M, K = x.shape
    n_out = folded[-1][0].shape[1]

    # Row tiling: never pad M.  If the whole batch would fit in one tile but
    # is non-trivial, split it in two so v7x's second TensorCore gets work.
    if M <= tm:
        if M >= 16:
            tm = ((pl.cdiv(M, 2) + 7) // 8) * 8      # 2 row blocks, 8-aligned
        else:
            tm = M                                   # single full block
    grid = (pl.cdiv(M, tm),)                         # ragged last block masked

    in_specs = [pl.BlockSpec((tm, K), lambda i: (i, 0))]
    flat_args = [x]
    for w, b in folded:
        in_specs += [
            pl.BlockSpec(w.shape, lambda i: (0, 0)),  # full weight, VMEM-resident
            pl.BlockSpec(b.shape, lambda i: (0, 0)),  # per-feature bias (1, N)
        ]
        flat_args += [w, b]

    return pl.pallas_call(
        functools.partial(_fused_mlp_kernel, compute_dtype=compute_dtype),
        out_shape=jax.ShapeDtypeStruct((M, n_out), jnp.float32),
        grid=grid,
        in_specs=in_specs,
        out_specs=pl.BlockSpec((tm, n_out), lambda i: (i, 0)),
        compiler_params=pltpu.CompilerParams(
            dimension_semantics=("parallel",),        # megacore over row blocks
            vmem_limit_bytes=32 * 1024 * 1024,        # safe on v5e/v6e/v7x
        ),
    )(*flat_args)


# ----------------------------------------------------------------------------
# Deterministic synthetic parameters (Linear + BatchNorm1d running stats)
# ----------------------------------------------------------------------------
def _block_params(key, cin, cout):
    k = jax.random.split(key, 6)
    return dict(
        w=jax.random.normal(k[0], (cin, cout), jnp.float32) / jnp.sqrt(cin),
        b=0.01 * jax.random.normal(k[1], (cout,), jnp.float32),
        gamma=1.0 + 0.1 * jax.random.normal(k[2], (cout,), jnp.float32),
        beta=0.1 * jax.random.normal(k[3], (cout,), jnp.float32),
        mean=0.1 * jax.random.normal(k[4], (cout,), jnp.float32),
        var=1.0 + 0.1 * jax.random.uniform(k[5], (cout,), jnp.float32),
    )


def init_params(key, no_class):
    ks = jax.random.split(key, 4)
    return dict(
        fc1=_block_params(ks[0], 512, 512),
        fc2=_block_params(ks[1], 512, 128),
        fc3=_block_params(ks[2], 128, 64),
        fc_out=_block_params(ks[3], 64, no_class),
    )


# ----------------------------------------------------------------------------
# Pure-JAX references for correctness checking
# ----------------------------------------------------------------------------
def _ref_forward_f32(params, x, eps=1e-5):
    """Exact eval-mode BASELINE forward in f32 (PyTorch semantics)."""
    h = x.astype(jnp.float32)
    for name in ("fc1", "fc2", "fc3", "fc_out"):
        p = params[name]
        h = h @ p["w"] + p["b"]
        h = (h - p["mean"]) / jnp.sqrt(p["var"] + eps) * p["gamma"] + p["beta"]
        h = jnp.maximum(h, 0.0)
    return h


def _ref_forward_same_math(folded, x):
    """Same folded-bf16 math as the kernel (bf16 matmul, f32 accumulate)."""
    compute_dtype = folded[0][0].dtype
    h = x.astype(compute_dtype)
    for idx, (w, b) in enumerate(folded):
        acc = jnp.dot(h, w, preferred_element_type=jnp.float32)
        acc = jnp.maximum(acc + b, 0.0)
        h = acc.astype(compute_dtype) if idx + 1 < len(folded) else acc
    return h


if __name__ == "__main__":
    no_class = 10
    key = jax.random.PRNGKey(0)
    pkey, xkey = jax.random.split(key)
    params = init_params(pkey, no_class)
    x = jax.random.normal(xkey, (2, 512), jnp.float32)   # (batch=2, features=512)

    folded = prepare_params(params)                       # fold once, outside jit
    fwd = jax.jit(functools.partial(baseline_forward, folded))
    out = jax.block_until_ready(fwd(x))

    assert out.shape == (2, no_class)
    assert bool(jnp.all(jnp.isfinite(out)))
    # Tight check vs. an identical-math (bf16 GEMM, f32 epilogue) reference.
    ref_same = _ref_forward_same_math(folded, x)
    assert bool(jnp.allclose(out, ref_same, atol=1e-3, rtol=1e-3))
    # Loose check vs. the exact f32 PyTorch-semantics reference (bf16 rounding).
    ref_f32 = _ref_forward_f32(params, x)
    assert bool(jnp.allclose(out, ref_f32, atol=5e-2, rtol=5e-2))
    print("KERNEL_OK")
</pallas_src>

<mosaic_0001>
module attributes {stable_mosaic.version = 11 : i64} {
  func.func @_fused_mlp_kernel(%arg0: i32, %arg1: memref<2x512xbf16, #tpu.memory_space<vmem>>, %arg2: memref<512x512xbf16, #tpu.memory_space<vmem>>, %arg3: memref<1x512xf32, #tpu.memory_space<vmem>>, %arg4: memref<512x128xbf16, #tpu.memory_space<vmem>>, %arg5: memref<1x128xf32, #tpu.memory_space<vmem>>, %arg6: memref<128x64xbf16, #tpu.memory_space<vmem>>, %arg7: memref<1x64xf32, #tpu.memory_space<vmem>>, %arg8: memref<64x10xbf16, #tpu.memory_space<vmem>>, %arg9: memref<1x10xf32, #tpu.memory_space<vmem>>, %arg10: memref<2x10xf32, #tpu.memory_space<vmem>>) attributes {dimension_semantics = [#tpu.dimension_semantics<parallel>], iteration_bounds = array<i64: 1>, scalar_prefetch = 0 : i64, scratch_operands = 0 : i64, tpu.core_type = #tpu.core_type<tc>, window_params = [{transform_indices = @transform_0, window_bounds = array<i64: 2, 512>}, {pipeline_mode = #tpu.pipeline_mode<synchronous>, transform_indices = @transform_1, window_bounds = array<i64: 512, 512>}, {pipeline_mode = #tpu.pipeline_mode<synchronous>, transform_indices = @transform_2, window_bounds = array<i64: 1, 512>}, {pipeline_mode = #tpu.pipeline_mode<synchronous>, transform_indices = @transform_3, window_bounds = array<i64: 512, 128>}, {pipeline_mode = #tpu.pipeline_mode<synchronous>, transform_indices = @transform_4, window_bounds = array<i64: 1, 128>}, {pipeline_mode = #tpu.pipeline_mode<synchronous>, transform_indices = @transform_5, window_bounds = array<i64: 128, 64>}, {pipeline_mode = #tpu.pipeline_mode<synchronous>, transform_indices = @transform_6, window_bounds = array<i64: 1, 64>}, {pipeline_mode = #tpu.pipeline_mode<synchronous>, transform_indices = @transform_7, window_bounds = array<i64: 64, 10>}, {pipeline_mode = #tpu.pipeline_mode<synchronous>, transform_indices = @transform_8, window_bounds = array<i64: 1, 10>}, {transform_indices = @transform_9, window_bounds = array<i64: 2, 10>}]} {
    %c0 = arith.constant 0 : index
    %c0_0 = arith.constant 0 : index
    %0 = vector.load %arg1[%c0, %c0_0] : memref<2x512xbf16, #tpu.memory_space<vmem>>, vector<2x512xbf16>
    %c0_1 = arith.constant 0 : index
    %c0_2 = arith.constant 0 : index
    %1 = vector.load %arg2[%c0_1, %c0_2] : memref<512x512xbf16, #tpu.memory_space<vmem>>, vector<512x512xbf16>
    %cst = arith.constant dense<0.000000e+00> : vector<2x512xf32>
    %2 = tpu.matmul %0, %1, %cst {dimension_numbers = #tpu.dot_dimension_numbers<[1], [0], [0], [1], [0, 0, 1, 1], [], []>} : vector<2x512xbf16>, vector<512x512xbf16>, vector<2x512xf32> -> vector<2x512xf32>
    %c0_3 = arith.constant 0 : index
    %c0_4 = arith.constant 0 : index
    %3 = vector.load %arg3[%c0_3, %c0_4] : memref<1x512xf32, #tpu.memory_space<vmem>>, vector<1x512xf32>
    %4 = vector.broadcast %3 : vector<1x512xf32> to vector<2x512xf32>
    %5 = arith.addf %2, %4 : vector<2x512xf32>
    %cst_5 = arith.constant 0.000000e+00 : f32
    %6 = vector.broadcast %cst_5 : f32 to vector<2x512xf32>
    %7 = arith.maximumf %5, %6 : vector<2x512xf32>
    %8 = arith.truncf %7 : vector<2x512xf32> to vector<2x512xbf16>
    %c0_6 = arith.constant 0 : index
    %c0_7 = arith.constant 0 : index
    %9 = vector.load %arg4[%c0_6, %c0_7] : memref<512x128xbf16, #tpu.memory_space<vmem>>, vector<512x128xbf16>
    %cst_8 = arith.constant dense<0.000000e+00> : vector<2x128xf32>
    %10 = tpu.matmul %8, %9, %cst_8 {dimension_numbers = #tpu.dot_dimension_numbers<[1], [0], [0], [1], [0, 0, 1, 1], [], []>} : vector<2x512xbf16>, vector<512x128xbf16>, vector<2x128xf32> -> vector<2x128xf32>
    %c0_9 = arith.constant 0 : index
    %c0_10 = arith.constant 0 : index
    %11 = vector.load %arg5[%c0_9, %c0_10] : memref<1x128xf32, #tpu.memory_space<vmem>>, vector<1x128xf32>
    %12 = vector.broadcast %11 : vector<1x128xf32> to vector<2x128xf32>
    %13 = arith.addf %10, %12 : vector<2x128xf32>
    %cst_11 = arith.constant 0.000000e+00 : f32
    %14 = vector.broadcast %cst_11 : f32 to vector<2x128xf32>
    %15 = arith.maximumf %13, %14 : vector<2x128xf32>
    %16 = arith.truncf %15 : vector<2x128xf32> to vector<2x128xbf16>
    %c0_12 = arith.constant 0 : index
    %c0_13 = arith.constant 0 : index
    %17 = vector.load %arg6[%c0_12, %c0_13] : memref<128x64xbf16, #tpu.memory_space<vmem>>, vector<128x64xbf16>
    %cst_14 = arith.constant dense<0.000000e+00> : vector<2x64xf32>
    %18 = tpu.matmul %16, %17, %cst_14 {dimension_numbers = #tpu.dot_dimension_numbers<[1], [0], [0], [1], [0, 0, 1, 1], [], []>} : vector<2x128xbf16>, vector<128x64xbf16>, vector<2x64xf32> -> vector<2x64xf32>
    %c0_15 = arith.constant 0 : index
    %c0_16 = arith.constant 0 : index
    %19 = vector.load %arg7[%c0_15, %c0_16] : memref<1x64xf32, #tpu.memory_space<vmem>>, vector<1x64xf32>
    %20 = vector.broadcast %19 : vector<1x64xf32> to vector<2x64xf32>
    %21 = arith.addf %18, %20 : vector<2x64xf32>
    %cst_17 = arith.constant 0.000000e+00 : f32
    %22 = vector.broadcast %cst_17 : f32 to vector<2x64xf32>
    %23 = arith.maximumf %21, %22 : vector<2x64xf32>
    %24 = arith.truncf %23 : vector<2x64xf32> to vector<2x64xbf16>
    %c0_18 = arith.constant 0 : index
    %c0_19 = arith.constant 0 : index
    %25 = vector.load %arg8[%c0_18, %c0_19] : memref<64x10xbf16, #tpu.memory_space<vmem>>, vector<64x10xbf16>
    %cst_20 = arith.constant dense<0.000000e+00> : vector<2x10xf32>
    %26 = tpu.matmul %24, %25, %cst_20 {dimension_numbers = #tpu.dot_dimension_numbers<[1], [0], [0], [1], [0, 0, 1, 1], [], []>} : vector<2x64xbf16>, vector<64x10xbf16>, vector<2x10xf32> -> vector<2x10xf32>
    %c0_21 = arith.constant 0 : index
    %c0_22 = arith.constant 0 : index
    %27 = vector.load %arg9[%c0_21, %c0_22] : memref<1x10xf32, #tpu.memory_space<vmem>>, vector<1x10xf32>
    %28 = vector.broadcast %27 : vector<1x10xf32> to vector<2x10xf32>
    %29 = arith.addf %26, %28 : vector<2x10xf32>
    %cst_23 = arith.constant 0.000000e+00 : f32
    %30 = vector.broadcast %cst_23 : f32 to vector<2x10xf32>
    %31 = arith.maximumf %29, %30 : vector<2x10xf32>
    %c0_24 = arith.constant 0 : index
    %c0_25 = arith.constant 0 : index
    %32 = vector.load %arg10[%c0_24, %c0_25] : memref<2x10xf32, #tpu.memory_space<vmem>>, vector<2x10xf32>
    tpu.vector_store %arg10[%c0_24, %c0_25], %31 {strides = array<i32>} : memref<2x10xf32, #tpu.memory_space<vmem>>, vector<2x10xf32>,
    return
  }
  func.func @transform_0(%arg0: i32) -> (i32, i32) {
    %c0_i32 = arith.constant 0 : i32
    %c0_i32_0 = arith.constant 0 : i32
    return %arg0, %c0_i32 : i32, i32
  }
  func.func @transform_1(%arg0: i32) -> (i32, i32) {
    %c0_i32 = arith.constant 0 : i32
    %c0_i32_0 = arith.constant 0 : i32
    %c0_i32_1 = arith.constant 0 : i32
    return %c0_i32, %c0_i32_0 : i32, i32
  }
  func.func @transform_2(%arg0: i32) -> (i32, i32) {
    %c0_i32 = arith.constant 0 : i32
    %c0_i32_0 = arith.constant 0 : i32
    %c0_i32_1 = arith.constant 0 : i32
    return %c0_i32, %c0_i32_0 : i32, i32
  }
  func.func @transform_3(%arg0: i32) -> (i32, i32) {
    %c0_i32 = arith.constant 0 : i32
    %c0_i32_0 = arith.constant 0 : i32
    %c0_i32_1 = arith.constant 0 : i32
    return %c0_i32, %c0_i32_0 : i32, i32
  }
  func.func @transform_4(%arg0: i32) -> (i32, i32) {
    %c0_i32 = arith.constant 0 : i32
    %c0_i32_0 = arith.constant 0 : i32
    %c0_i32_1 = arith.constant 0 : i32
    return %c0_i32, %c0_i32_0 : i32, i32
  }
  func.func @transform_5(%arg0: i32) -> (i32, i32) {
    %c0_i32 = arith.constant 0 : i32
    %c0_i32_0 = arith.constant 0 : i32
    %c0_i32_1 = arith.constant 0 : i32
    return %c0_i32, %c0_i32_0 : i32, i32
  }
  func.func @transform_6(%arg0: i32) -> (i32, i32) {
    %c0_i32 = arith.constant 0 : i32
    %c0_i32_0 = arith.constant 0 : i32
    %c0_i32_1 = arith.constant 0 : i32
    return %c0_i32, %c0_i32_0 : i32, i32
  }
  func.func @transform_7(%arg0: i32) -> (i32, i32) {
    %c0_i32 = arith.constant 0 : i32
    %c0_i32_0 = arith.constant 0 : i32
    %c0_i32_1 = arith.constant 0 : i32
    return %c0_i32, %c0_i32_0 : i32, i32
  }
  func.func @transform_8(%arg0: i32) -> (i32, i32) {
    %c0_i32 = arith.constant 0 : i32
    %c0_i32_0 = arith.constant 0 : i32
    %c0_i32_1 = arith.constant 0 : i32
    return %c0_i32, %c0_i32_0 : i32, i32
  }
  func.func @transform_9(%arg0: i32) -> (i32, i32) {
    %c0_i32 = arith.constant 0 : i32
    %c0_i32_0 = arith.constant 0 : i32
    return %arg0, %c0_i32 : i32, i32
  }
}

</mosaic_0001>

<bundles_post_ra>
// kernel: baseline_forward.1
= control target key start
LH: loop header
LB: loop body
LE: loop exit
PB: predicated region body
PF: predicated region fallthrough
CT: control target
= control target key end

     0   :  { %v165_v38 = vlaneseq  ;;  %v2127_v39 = vmov 1966171168   ;;  %s2751_s0 = inlined_call_operand.vmem [shape: bf16[2,512], index: 0, kind: input, shape index: {}]   ;;  %s2752_s1 = inlined_call_operand.vmem [shape: bf16[512,512], index: 1, kind: input, shape index: {}]   ;;  %s2753_s2 = inlined_call_operand.vmem [shape: f32[1,512], index: 2, kind: input, shape index: {}]   ;;  %s2754_s3 = inlined_call_operand.vmem [shape: bf16[512,128], index: 3, kind: input, shape index: {}]   ;;  %s2755_s4 = inlined_call_operand.vmem [shape: f32[1,128], index: 4, kind: input, shape index: {}]   ;;  %s2756_s5 = inlined_call_operand.vmem [shape: bf16[128,64], index: 5, kind: input, shape index: {}]   ;;  %s2757_s6 = inlined_call_operand.vmem [shape: f32[1,64], index: 6, kind: input, shape index: {}]   ;;  %s2758_s7 = inlined_call_operand.vmem [shape: bf16[64,10], index: 7, kind: input, shape index: {}]   ;;  %s2759_s8 = inlined_call_operand.vmem [shape: f32[1,10], index: 8, kind: input, shape index: {}]   ;;  %s2760_s9 = inlined_call_operand.hbm [shape: f32[2,10], index: 9, kind: output, shape index: {}]  }
   0x1   :  { %v1867_v0 = vld [vmem:[%s2752_s1 + $0x4] ss:$16 sps:$4 sm:$0xff]   ;;  %v1869_v1 = vld [vmem:[%s2752_s1 + $0xc] ss:$16 sps:$4 sm:$0xff]   ;;  %v1871_v2 = vld [vmem:[%s2752_s1] ss:$16 sps:$4 sm:$0xff]   ;;  %v195_v40 = vunpack.c.l.s4 %v2127_v39 }
   0x2   :  { %854 = vmatprep.subr.bf16.mxu0 %v1867_v0  ;;  %v1872_v3 = vld [vmem:[%s2752_s1 + $0x8] ss:$16 sps:$4 sm:$0xff]   ;;  %936 = vmatprep.subr.bf16.mxu1 %v1869_v1  ;;  %v1873_v4 = vld [vmem:[%s2752_s1 + $0x24] ss:$16 sps:$4 sm:$0xff]   ;;  %v1875_v5 = vld [vmem:[%s2752_s1 + $0x2c] ss:$16 sps:$4 sm:$0xff]  }
   0x3   :  { %855 = vmatpush1.bf16.msra.mxu0 %v1871_v2  ;;  %937 = vmatpush1.bf16.msra.mxu1 %v1872_v3  ;;  %v1877_v6 = vld [vmem:[%s2752_s1 + $0x20] ss:$16 sps:$4 sm:$0xff]   ;;  %v1878_v7 = vld [vmem:[%s2752_s1 + $0x28] ss:$16 sps:$4 sm:$0xff]   ;;  %v1879_v8 = vld [vmem:[%s2752_s1 + $0x44] ss:$16 sps:$4 sm:$0xff]   ;;  %v196_v46 = vunpack.c.0.s8 %v195_v40 }
   0x4   :  { %856 = vmatprep.subr.bf16.mxu0 %v1873_v4  ;;  %938 = vmatprep.subr.bf16.mxu1 %v1875_v5  ;;  %v1881_v9 = vld [vmem:[%s2752_s1 + $0x4c] ss:$16 sps:$4 sm:$0xff]   ;;  %v1883_v10 = vld [vmem:[%s2752_s1 + $0x40] ss:$16 sps:$4 sm:$0xff]   ;;  %v1884_v11 = vld [vmem:[%s2752_s1 + $0x48] ss:$16 sps:$4 sm:$0xff]  }
   0x5   :  { %v1885_v12 = vld [vmem:[%s2752_s1 + $0x64] ss:$16 sps:$4 sm:$0xff]   ;;  %v1887_v13 = vld [vmem:[%s2752_s1 + $0x6c] ss:$16 sps:$4 sm:$0xff]   ;;  %v1889_v14 = vld [vmem:[%s2752_s1 + $0x60] ss:$16 sps:$4 sm:$0xff]  }
   0x6   :  { %v1890_v15 = vld [vmem:[%s2752_s1 + $0x68] ss:$16 sps:$4 sm:$0xff]   ;;  %v1891_v16 = vld [vmem:[%s2752_s1 + $0x84] ss:$16 sps:$4 sm:$0xff]   ;;  %v1893_v17 = vld [vmem:[%s2752_s1 + $0x8c] ss:$16 sps:$4 sm:$0xff]  }
   0x7   :  { %857 = vmatpush1.bf16.msra.mxu0 %v1877_v6  ;;  %939 = vmatpush1.bf16.msra.mxu1 %v1878_v7  ;;  %v1895_v18 = vld [vmem:[%s2752_s1 + $0x80] ss:$16 sps:$4 sm:$0xff]   ;;  %v1896_v19 = vld [vmem:[%s2752_s1 + $0x88] ss:$16 sps:$4 sm:$0xff]   ;;  %v1897_v20 = vld [vmem:[%s2752_s1 + $0xa4] ss:$16 sps:$4 sm:$0xff]  }
   0x8   :  { %858 = vmatprep.subr.bf16.mxu0 %v1879_v8  ;;  %940 = vmatprep.subr.bf16.mxu1 %v1881_v9  ;;  %v1899_v21 = vld [vmem:[%s2752_s1 + $0xac] ss:$16 sps:$4 sm:$0xff]   ;;  %v1901_v22 = vld [vmem:[%s2752_s1 + $0xa0] ss:$16 sps:$4 sm:$0xff]   ;;  %v1902_v23 = vld [vmem:[%s2752_s1 + $0xa8] ss:$16 sps:$4 sm:$0xff]  }
   0x9   :  { %v1903_v24 = vld [vmem:[%s2752_s1 + $0xc4] ss:$16 sps:$4 sm:$0xff]   ;;  %v1905_v25 = vld [vmem:[%s2752_s1 + $0xcc] ss:$16 sps:$4 sm:$0xff]   ;;  %v1907_v26 = vld [vmem:[%s2752_s1 + $0xc0] ss:$16 sps:$4 sm:$0xff]  }
   0xa   :  { %v1908_v27 = vld [vmem:[%s2752_s1 + $0xc8] ss:$16 sps:$4 sm:$0xff]   ;;  %v1909_v28 = vld [vmem:[%s2752_s1 + $0xe4] ss:$16 sps:$4 sm:$0xff]   ;;  %v1911_v29 = vld [vmem:[%s2752_s1 + $0xec] ss:$16 sps:$4 sm:$0xff]  }
   0xb   :  { %859 = vmatpush1.bf16.msra.mxu0 %v1883_v10  ;;  %941 = vmatpush1.bf16.msra.mxu1 %v1884_v11  ;;  %v1913_v30 = vld [vmem:[%s2752_s1 + $0xe0] ss:$16 sps:$4 sm:$0xff]   ;;  %v1914_v31 = vld [vmem:[%s2752_s1 + $0xe8] ss:$16 sps:$4 sm:$0xff]   ;;  %v1915_v32 = vld [vmem:[%s2752_s1 + $0x104] ss:$16 sps:$4 sm:$0xff]  }
   0xc   :  { %860 = vmatprep.subr.bf16.mxu0 %v1885_v12  ;;  %942 = vmatprep.subr.bf16.mxu1 %v1887_v13  ;;  %v1917_v33 = vld [vmem:[%s2752_s1 + $0x10c] ss:$16 sps:$4 sm:$0xff]   ;;  %v1919_v34 = vld [vmem:[%s2752_s1 + $0x100] ss:$16 sps:$4 sm:$0xff]   ;;  %v1920_v35 = vld [vmem:[%s2752_s1 + $0x108] ss:$16 sps:$4 sm:$0xff]  }
   0xd   :  { %v1921_v36 = vld [vmem:[%s2752_s1 + $0x124] ss:$16 sps:$4 sm:$0xff]   ;;  %v1923_v37 = vld [vmem:[%s2752_s1 + $0x12c] ss:$16 sps:$4 sm:$0xff]   ;;  %v1925_v41 = vld [vmem:[%s2752_s1 + $0x120] ss:$16 sps:$4 sm:$0xff]  }
   0xe   :  { %v1926_v42 = vld [vmem:[%s2752_s1 + $0x128] ss:$16 sps:$4 sm:$0xff]   ;;  %v1927_v43 = vld [vmem:[%s2752_s1 + $0x144] ss:$16 sps:$4 sm:$0xff]   ;;  %v1929_v44 = vld [vmem:[%s2752_s1 + $0x14c] ss:$16 sps:$4 sm:$0xff]  }
   0xf   :  { %861 = vmatpush1.bf16.msra.mxu0 %v1889_v14  ;;  %943 = vmatpush1.bf16.msra.mxu1 %v1890_v15  ;;  %v2307_v45 = vshrl.u32 %v165_v38, 7  ;;  %v1931_v47 = vld [vmem:[%s2752_s1 + $0x140] ss:$16 sps:$4 sm:$0xff]   ;;  %v1932_v48 = vld [vmem:[%s2752_s1 + $0x148] ss:$16 sps:$4 sm:$0xff]  }
  0x10   :  { %862 = vmatprep.subr.bf16.mxu0 %v1891_v16  ;;  %944 = vmatprep.subr.bf16.mxu1 %v1893_v17  ;;  %v1933_v49 = vld [vmem:[%s2752_s1 + $0x164] ss:$16 sps:$4 sm:$0xff]   ;;  %v1935_v50 = vld [vmem:[%s2752_s1 + $0x16c] ss:$16 sps:$4 sm:$0xff]   ;;  %v1937_v53 = vld [vmem:[%s2752_s1 + $0x160] ss:$16 sps:$4 sm:$0xff]  }
  0x11   :  { %v199_v51 = vsub.s32 %v196_v46, %v2307_v45  ;;  %v1584_v52 = vld.sshfl [vmem:[%s2751_s0] sm:$0x33 pattern:$0x75316420]  ;;  %v1938_v54 = vld [vmem:[%s2752_s1 + $0x168] ss:$16 sps:$4 sm:$0xff]  }
  0x12   :  { %v193_v55 = vcombine.high %v1584_v52, %v1584_v52  ;;  %v1939_v56 = vld [vmem:[%s2752_s1 + $0x184] ss:$16 sps:$4 sm:$0xff]   ;;  %v1941_v57 = vld [vmem:[%s2752_s1 + $0x18c] ss:$16 sps:$4 sm:$0xff]   ;;  %v1943_v59 = vld [vmem:[%s2752_s1 + $0x180] ss:$16 sps:$4 sm:$0xff]  }
  0x13   :  { %863 = vmatpush1.bf16.msra.mxu0 %v1895_v18  ;;  %945 = vmatpush1.bf16.msra.mxu1 %v1896_v19  ;;  %v1944_v60 = vld [vmem:[%s2752_s1 + $0x188] ss:$16 sps:$4 sm:$0xff]   ;;  %v1945_v61 = vld [vmem:[%s2752_s1 + $0x1a4] ss:$16 sps:$4 sm:$0xff]   ;;  %v1947_v62 = vld [vmem:[%s2752_s1 + $0x1ac] ss:$16 sps:$4 sm:$0xff]   ;;  %v2388_v12 = vrot.slane %v1584_v52, %v199_v51 }
  0x14   :  { %864 = vmatprep.subr.bf16.mxu0 %v1897_v20  ;;  %946 = vmatprep.subr.bf16.mxu1 %v1899_v21  ;;  %v207_v58 = vrot.slane %v193_v55, %v199_v51  ;;  %v1949_v63 = vld [vmem:[%s2752_s1 + $0x1a0] ss:$16 sps:$4 sm:$0xff]   ;;  %v1950_v0 = vld [vmem:[%s2752_s1 + $0x1a8] ss:$16 sps:$4 sm:$0xff]   ;;  %v1951_v1 = vld [vmem:[%s2752_s1 + $0x1c4] ss:$16 sps:$4 sm:$0xff]  }
  0x15   :  { %v1953_v2 = vld [vmem:[%s2752_s1 + $0x1cc] ss:$16 sps:$4 sm:$0xff]   ;;  %v1955_v3 = vld [vmem:[%s2752_s1 + $0x1c0] ss:$16 sps:$4 sm:$0xff]   ;;  %v1956_v4 = vld [vmem:[%s2752_s1 + $0x1c8] ss:$16 sps:$4 sm:$0xff]  }
  0x16   :  { %886 = vmatprep.mubr.bf16.mxu0 %v207_v58  ;;  %968 = vmatprep.mubr.bf16.mxu1 %v207_v58  ;;  %v1957_v5 = vld [vmem:[%s2752_s1 + $0x1e4] ss:$16 sps:$4 sm:$0xff]   ;;  %v1959_v6 = vld [vmem:[%s2752_s1 + $0x1ec] ss:$16 sps:$4 sm:$0xff]   ;;  %v1961_v7 = vld [vmem:[%s2752_s1 + $0x1e0] ss:$16 sps:$4 sm:$0xff]   ;;  %v209_v16 = vcombine.high %v207_v58, %v207_v58 }
  0x17   :  { %865 = vmatpush1.bf16.msra.mxu0 %v1901_v22  ;;  %947 = vmatpush1.bf16.msra.mxu1 %v1902_v23  ;;  %v1962_v8 = vld [vmem:[%s2752_s1 + $0x1e8] ss:$16 sps:$4 sm:$0xff]   ;;  %v1965_v9 = vld [vmem:[%s2752_s1 + $0x204] ss:$16 sps:$4 sm:$0xff]   ;;  %v1968_v10 = vld [vmem:[%s2752_s1 + $0x20c] ss:$16 sps:$4 sm:$0xff]  }
  0x18   :  { %866 = vmatprep.subr.bf16.mxu0 %v1903_v24  ;;  %948 = vmatprep.subr.bf16.mxu1 %v1905_v25  ;;  %v1963_v11 = vld [vmem:[%s2752_s1 + $0x200] ss:$16 sps:$4 sm:$0xff]   ;;  %v1966_v13 = vld [vmem:[%s2752_s1 + $0x208] ss:$16 sps:$4 sm:$0xff]   ;;  %v1971_v14 = vld [vmem:[%s2752_s1 + $0x224] ss:$16 sps:$4 sm:$0xff]  }
  0x19   :  { %v1974_v15 = vld [vmem:[%s2752_s1 + $0x22c] ss:$16 sps:$4 sm:$0xff]   ;;  %v1969_v17 = vld [vmem:[%s2752_s1 + $0x220] ss:$16 sps:$4 sm:$0xff]   ;;  %v1972_v18 = vld [vmem:[%s2752_s1 + $0x228] ss:$16 sps:$4 sm:$0xff]  }
  0x1a   :  { %v1977_v19 = vld [vmem:[%s2752_s1 + $0x244] ss:$16 sps:$4 sm:$0xff]   ;;  %v1980_v20 = vld [vmem:[%s2752_s1 + $0x24c] ss:$16 sps:$4 sm:$0xff]   ;;  %v1975_v21 = vld [vmem:[%s2752_s1 + $0x240] ss:$16 sps:$4 sm:$0xff]  }
  0x1b   :  { %867 = vmatpush1.bf16.msra.mxu0 %v1907_v26  ;;  %949 = vmatpush1.bf16.msra.mxu1 %v1908_v27  ;;  %v1978_v22 = vld [vmem:[%s2752_s1 + $0x248] ss:$16 sps:$4 sm:$0xff]   ;;  %v1983_v23 = vld [vmem:[%s2752_s1 + $0x264] ss:$16 sps:$4 sm:$0xff]   ;;  %v1986_v24 = vld [vmem:[%s2752_s1 + $0x26c] ss:$16 sps:$4 sm:$0xff]  }
  0x1c   :  { %868 = vmatprep.subr.bf16.mxu0 %v1909_v28  ;;  %950 = vmatprep.subr.bf16.mxu1 %v1911_v29  ;;  %v1981_v25 = vld [vmem:[%s2752_s1 + $0x260] ss:$16 sps:$4 sm:$0xff]   ;;  %v1984_v26 = vld [vmem:[%s2752_s1 + $0x268] ss:$16 sps:$4 sm:$0xff]   ;;  %v1989_v27 = vld [vmem:[%s2752_s1 + $0x284] ss:$16 sps:$4 sm:$0xff]  }
  0x1d   :  { %v1992_v28 = vld [vmem:[%s2752_s1 + $0x28c] ss:$16 sps:$4 sm:$0xff]   ;;  %v1987_v29 = vld [vmem:[%s2752_s1 + $0x280] ss:$16 sps:$4 sm:$0xff]   ;;  %v2002_v38 = vld [vmem:[%s2752_s1 + $0x2c8] ss:$16 sps:$4 sm:$0xff]  }
  0x1e   :  { %v2007_v39 = vld [vmem:[%s2752_s1 + $0x2e4] ss:$16 sps:$4 sm:$0xff]   ;;  %v2010_v40 = vld [vmem:[%s2752_s1 + $0x2ec] ss:$16 sps:$4 sm:$0xff]   ;;  %v2011_v46 = vld [vmem:[%s2752_s1 + $0x300] ss:$16 sps:$4 sm:$0xff]  }
  0x1f   :  { %869 = vmatpush1.bf16.msra.mxu0 %v1913_v30  ;;  %951 = vmatpush1.bf16.msra.mxu1 %v1914_v31  ;;  %v1990_v30 = vld [vmem:[%s2752_s1 + $0x288] ss:$16 sps:$4 sm:$0xff]   ;;  %v1995_v31 = vld [vmem:[%s2752_s1 + $0x2a4] ss:$16 sps:$4 sm:$0xff]   ;;  %v2029_v58 = vld [vmem:[%s2752_s1 + $0x360] ss:$16 sps:$4 sm:$0xff]  }
  0x20   :  { %870 = vmatprep.subr.bf16.mxu0 %v1915_v32  ;;  %952 = vmatprep.subr.bf16.mxu1 %v1917_v33  ;;  %v1998_v32 = vld [vmem:[%s2752_s1 + $0x2ac] ss:$16 sps:$4 sm:$0xff]   ;;  %v1993_v33 = vld [vmem:[%s2752_s1 + $0x2a0] ss:$16 sps:$4 sm:$0xff]   ;;  %v2020_v51 = vld [vmem:[%s2752_s1 + $0x328] ss:$16 sps:$4 sm:$0xff]  }
  0x21   :  { %v2025_v52 = vld [vmem:[%s2752_s1 + $0x344] ss:$16 sps:$4 sm:$0xff]   ;;  %v2026_v55 = vld [vmem:[%s2752_s1 + $0x348] ss:$16 sps:$4 sm:$0xff]  }
  0x23   :  { %871 = vmatpush1.bf16.msra.mxu0 %v1919_v34  ;;  %953 = vmatpush1.bf16.msra.mxu1 %v1920_v35  ;;  %v1996_v34 = vld [vmem:[%s2752_s1 + $0x2a8] ss:$16 sps:$4 sm:$0xff]   ;;  %v2001_v35 = vld [vmem:[%s2752_s1 + $0x2c4] ss:$16 sps:$4 sm:$0xff]  }
  0x24   :  { %872 = vmatprep.subr.bf16.mxu0 %v1921_v36  ;;  %954 = vmatprep.subr.bf16.mxu1 %v1923_v37  ;;  %v2004_v36 = vld [vmem:[%s2752_s1 + $0x2cc] ss:$16 sps:$4 sm:$0xff]   ;;  %v1999_v37 = vld [vmem:[%s2752_s1 + $0x2c0] ss:$16 sps:$4 sm:$0xff]  }
  0x27   :  { %873 = vmatpush1.bf16.msra.mxu0 %v1925_v41  ;;  %955 = vmatpush1.bf16.msra.mxu1 %v1926_v42  ;;  %v2005_v41 = vld [vmem:[%s2752_s1 + $0x2e0] ss:$16 sps:$4 sm:$0xff]   ;;  %v2008_v42 = vld [vmem:[%s2752_s1 + $0x2e8] ss:$16 sps:$4 sm:$0xff]  }
  0x28   :  { %874 = vmatprep.subr.bf16.mxu0 %v1927_v43  ;;  %956 = vmatprep.subr.bf16.mxu1 %v1929_v44  ;;  %v2013_v43 = vld [vmem:[%s2752_s1 + $0x304] ss:$16 sps:$4 sm:$0xff]   ;;  %v2016_v44 = vld [vmem:[%s2752_s1 + $0x30c] ss:$16 sps:$4 sm:$0xff]  }
  0x2b   :  { %875 = vmatpush1.bf16.msra.mxu0 %v1931_v47  ;;  %957 = vmatpush1.bf16.msra.mxu1 %v1932_v48  ;;  %v2014_v47 = vld [vmem:[%s2752_s1 + $0x308] ss:$16 sps:$4 sm:$0xff]   ;;  %v2019_v48 = vld [vmem:[%s2752_s1 + $0x324] ss:$16 sps:$4 sm:$0xff]  }
  0x2c   :  { %876 = vmatprep.subr.bf16.mxu0 %v1933_v49  ;;  %958 = vmatprep.subr.bf16.mxu1 %v1935_v50  ;;  %v2022_v49 = vld [vmem:[%s2752_s1 + $0x32c] ss:$16 sps:$4 sm:$0xff]   ;;  %v2017_v50 = vld [vmem:[%s2752_s1 + $0x320] ss:$16 sps:$4 sm:$0xff]  }
  0x2f   :  { %877 = vmatpush1.bf16.msra.mxu0 %v1937_v53  ;;  %959 = vmatpush1.bf16.msra.mxu1 %v1938_v54  ;;  %v2028_v53 = vld [vmem:[%s2752_s1 + $0x34c] ss:$16 sps:$4 sm:$0xff]   ;;  %v2023_v54 = vld [vmem:[%s2752_s1 + $0x340] ss:$16 sps:$4 sm:$0xff]  }
  0x30   :  { %878 = vmatprep.subr.bf16.mxu0 %v1939_v56  ;;  %960 = vmatprep.subr.bf16.mxu1 %v1941_v57  ;;  %v2031_v56 = vld [vmem:[%s2752_s1 + $0x364] ss:$16 sps:$4 sm:$0xff]   ;;  %v2034_v57 = vld [vmem:[%s2752_s1 + $0x36c] ss:$16 sps:$4 sm:$0xff]  }
  0x33   :  { %879 = vmatpush1.bf16.msra.mxu0 %v1943_v59  ;;  %961 = vmatpush1.bf16.msra.mxu1 %v1944_v60  ;;  %v2032_v59 = vld [vmem:[%s2752_s1 + $0x368] ss:$16 sps:$4 sm:$0xff]   ;;  %v2037_v60 = vld [vmem:[%s2752_s1 + $0x384] ss:$16 sps:$4 sm:$0xff]  }
  0x34   :  { %880 = vmatprep.subr.bf16.mxu0 %v1945_v61  ;;  %962 = vmatprep.subr.bf16.mxu1 %v1947_v62  ;;  %v2040_v61 = vld [vmem:[%s2752_s1 + $0x38c] ss:$16 sps:$4 sm:$0xff]   ;;  %v2035_v62 = vld [vmem:[%s2752_s1 + $0x380] ss:$16 sps:$4 sm:$0xff]  }
  0x37   :  { %881 = vmatpush1.bf16.msra.mxu0 %v1949_v63  ;;  %963 = vmatpush1.bf16.msra.mxu1 %v1950_v0  ;;  %v2038_v63 = vld [vmem:[%s2752_s1 + $0x388] ss:$16 sps:$4 sm:$0xff]   ;;  %v2043_v0 = vld [vmem:[%s2752_s1 + $0x3a4] ss:$16 sps:$4 sm:$0xff]  }
  0x38   :  { %882 = vmatprep.subr.bf16.mxu0 %v1951_v1  ;;  %964 = vmatprep.subr.bf16.mxu1 %v1953_v2  ;;  %v2046_v1 = vld [vmem:[%s2752_s1 + $0x3ac] ss:$16 sps:$4 sm:$0xff]   ;;  %v2041_v2 = vld [vmem:[%s2752_s1 + $0x3a0] ss:$16 sps:$4 sm:$0xff]  }
  0x3b   :  { %883 = vmatpush1.bf16.msra.mxu0 %v1955_v3  ;;  %965 = vmatpush1.bf16.msra.mxu1 %v1956_v4  ;;  %v2044_v3 = vld [vmem:[%s2752_s1 + $0x3a8] ss:$16 sps:$4 sm:$0xff]   ;;  %v2049_v4 = vld [vmem:[%s2752_s1 + $0x3c4] ss:$16 sps:$4 sm:$0xff]  }
  0x3c   :  { %884 = vmatprep.subr.bf16.mxu0 %v1957_v5  ;;  %966 = vmatprep.subr.bf16.mxu1 %v1959_v6  ;;  %v2052_v5 = vld [vmem:[%s2752_s1 + $0x3cc] ss:$16 sps:$4 sm:$0xff]   ;;  %v2047_v6 = vld [vmem:[%s2752_s1 + $0x3c0] ss:$16 sps:$4 sm:$0xff]  }
  0x3f   :  { %885 = vmatpush1.bf16.msra.mxu0 %v1961_v7  ;;  %967 = vmatpush1.bf16.msra.mxu1 %v1962_v8  ;;  %v2050_v7 = vld [vmem:[%s2752_s1 + $0x3c8] ss:$16 sps:$4 sm:$0xff]   ;;  %v2055_v8 = vld [vmem:[%s2752_s1 + $0x3e4] ss:$16 sps:$4 sm:$0xff]  }
  0x40   :  { %895 = vmatprep.subr.bf16.mxu0 %v1965_v9  ;;  %977 = vmatprep.subr.bf16.mxu1 %v1968_v10  ;;  %v2058_v9 = vld [vmem:[%s2752_s1 + $0x3ec] ss:$16 sps:$4 sm:$0xff]  }
  0x42   :  { %887 = vmatmul.mubr.bf16.vlgmr.msra.gmra.mrb[0].mxu0 %v2388_v12  ;;  %969 = vmatmul.mubr.bf16.vlgmr.msra.gmra.mrb[0].mxu1 %v2388_v12 }
  0x43   :  { %896 = vmatpush1.bf16.msra.mxu0 %v1963_v11  ;;  %978 = vmatpush1.bf16.msra.mxu1 %v1966_v13 }
  0x44   :  { %897 = vmatprep.subr.bf16.mxu0 %v1971_v14  ;;  %979 = vmatprep.subr.bf16.mxu1 %v1974_v15 }
  0x45   :  { %927 = vmatprep.mubr.bf16.mxu0 %v209_v16  ;;  %1009 = vmatprep.mubr.bf16.mxu1 %v209_v16 }
  0x47   :  { %898 = vmatpush1.bf16.msra.mxu0 %v1969_v17  ;;  %980 = vmatpush1.bf16.msra.mxu1 %v1972_v18 }
  0x48   :  { %899 = vmatprep.subr.bf16.mxu0 %v1977_v19  ;;  %981 = vmatprep.subr.bf16.mxu1 %v1980_v20 }
  0x4b   :  { %900 = vmatpush1.bf16.msra.mxu0 %v1975_v21  ;;  %982 = vmatpush1.bf16.msra.mxu1 %v1978_v22 }
  0x4c   :  { %901 = vmatprep.subr.bf16.mxu0 %v1983_v23  ;;  %983 = vmatprep.subr.bf16.mxu1 %v1986_v24 }
  0x4f   :  { %902 = vmatpush1.bf16.msra.mxu0 %v1981_v25  ;;  %984 = vmatpush1.bf16.msra.mxu1 %v1984_v26 }
  0x50   :  { %903 = vmatprep.subr.bf16.mxu0 %v1989_v27  ;;  %985 = vmatprep.subr.bf16.mxu1 %v1992_v28 }
  0x53   :  { %904 = vmatpush1.bf16.msra.mxu0 %v1987_v29  ;;  %986 = vmatpush1.bf16.msra.mxu1 %v1990_v30 }
  0x54   :  { %905 = vmatprep.subr.bf16.mxu0 %v1995_v31  ;;  %987 = vmatprep.subr.bf16.mxu1 %v1998_v32 }
  0x57   :  { %906 = vmatpush1.bf16.msra.mxu0 %v1993_v33  ;;  %988 = vmatpush1.bf16.msra.mxu1 %v1996_v34 }
  0x58   :  { %907 = vmatprep.subr.bf16.mxu0 %v2001_v35  ;;  %989 = vmatprep.subr.bf16.mxu1 %v2004_v36 }
  0x5b   :  { %908 = vmatpush1.bf16.msra.mxu0 %v1999_v37  ;;  %990 = vmatpush1.bf16.msra.mxu1 %v2002_v38 }
  0x5c   :  { %909 = vmatprep.subr.bf16.mxu0 %v2007_v39  ;;  %991 = vmatprep.subr.bf16.mxu1 %v2010_v40 }
  0x5f   :  { %910 = vmatpush1.bf16.msra.mxu0 %v2005_v41  ;;  %992 = vmatpush1.bf16.msra.mxu1 %v2008_v42 }
  0x60   :  { %911 = vmatprep.subr.bf16.mxu0 %v2013_v43  ;;  %993 = vmatprep.subr.bf16.mxu1 %v2016_v44 }
  0x63   :  { %912 = vmatpush1.bf16.msra.mxu0 %v2011_v46  ;;  %994 = vmatpush1.bf16.msra.mxu1 %v2014_v47 }
  0x64   :  { %913 = vmatprep.subr.bf16.mxu0 %v2019_v48  ;;  %995 = vmatprep.subr.bf16.mxu1 %v2022_v49 }
  0x67   :  { %914 = vmatpush1.bf16.msra.mxu0 %v2017_v50  ;;  %996 = vmatpush1.bf16.msra.mxu1 %v2020_v51 }
  0x68   :  { %915 = vmatprep.subr.bf16.mxu0 %v2025_v52  ;;  %997 = vmatprep.subr.bf16.mxu1 %v2028_v53 }
  0x6b   :  { %916 = vmatpush1.bf16.msra.mxu0 %v2023_v54  ;;  %998 = vmatpush1.bf16.msra.mxu1 %v2026_v55 }
  0x6c   :  { %917 = vmatprep.subr.bf16.mxu0 %v2031_v56  ;;  %999 = vmatprep.subr.bf16.mxu1 %v2034_v57 }
  0x6f   :  { %918 = vmatpush1.bf16.msra.mxu0 %v2029_v58  ;;  %1000 = vmatpush1.bf16.msra.mxu1 %v2032_v59 }
  0x70   :  { %919 = vmatprep.subr.bf16.mxu0 %v2037_v60  ;;  %1001 = vmatprep.subr.bf16.mxu1 %v2040_v61 }
  0x73   :  { %920 = vmatpush1.bf16.msra.mxu0 %v2035_v62  ;;  %1002 = vmatpush1.bf16.msra.mxu1 %v2038_v63 }
  0x74   :  { %921 = vmatprep.subr.bf16.mxu0 %v2043_v0  ;;  %1003 = vmatprep.subr.bf16.mxu1 %v2046_v1 }
  0x77   :  { %922 = vmatpush1.bf16.msra.mxu0 %v2041_v2  ;;  %1004 = vmatpush1.bf16.msra.mxu1 %v2044_v3 }
  0x78   :  { %923 = vmatprep.subr.bf16.mxu0 %v2049_v4  ;;  %1005 = vmatprep.subr.bf16.mxu1 %v2052_v5 }
  0x79   :  { %14 = vsyncpa [#allocation3], 0  ;;  %v2053_v10 = vld [vmem:[%s2752_s1 + $0x3e0] ss:$16 sps:$4 sm:$0xff]   ;;  %v2056_v11 = vld [vmem:[%s2752_s1 + $0x3e8] ss:$16 sps:$4 sm:$0xff]   ;;  %v208_v15 = vcombine.high %v2388_v12, %v2388_v12 }
  0x7a   :  { %v2059_v13 = vld [vmem:[%s2754_s3 + $0x40] sm:$0xff]   ;;  %v2063_v18 = vld [vmem:[%s2754_s3 + $0x48] sm:$0xff]   ;;  %v2067_v21 = vld [vmem:[%s2754_s3 + $0x50] sm:$0xff]   ;;  %v2128_v46 = vmov 0.0   ;;  %v167_v47 = vsub.s32 0, %v2307_v45  ;;  %v175_v48 = vsub.s32 2, %v2307_v45 }
  0x7b   :  { %924 = vmatpush1.bf16.msra.mxu0 %v2047_v6  ;;  %1006 = vmatpush1.bf16.msra.mxu1 %v2050_v7  ;;  %v2060_v14 = vld [vmem:[%s2754_s3 + $0xc0] sm:$0xff]   ;;  %v2064_v12 = vld [vmem:[%s2754_s3 + $0xc8] sm:$0xff]   ;;  %v2068_v22 = vld [vmem:[%s2754_s3 + $0xd0] sm:$0xff]   ;;  %v171_v50 = vsub.s32 1, %v2307_v45  ;;  %v179_v51 = vsub.s32 3, %v2307_v45  ;;  %vm2129_vm0 = vmmov 0  }
  0x7c   :  { %925 = vmatprep.subr.bf16.mxu0 %v2055_v8  ;;  %1007 = vmatprep.subr.bf16.mxu1 %v2058_v9  ;;  %v2061_v16 = vld [vmem:[%s2754_s3] sm:$0xff]   ;;  %v2065_v19 = vld [vmem:[%s2754_s3 + $0x8] sm:$0xff]   ;;  %v2069_v23 = vld [vmem:[%s2754_s3 + $0x10] sm:$0xff]   ;;  %vm1523_vm1 = vcmask 523264   ;;  %vm1568_vm2 = vcmask 74752  }
  0x7d   :  { %v2062_v17 = vld [vmem:[%s2754_s3 + $0x80] sm:$0xff]   ;;  %v2066_v20 = vld [vmem:[%s2754_s3 + $0x88] sm:$0xff]   ;;  %v2070_v24 = vld [vmem:[%s2754_s3 + $0x90] sm:$0xff]  }
  0x7e   :  { %v2071_v25 = vld [vmem:[%s2754_s3 + $0x58] sm:$0xff]   ;;  %v2075_v29 = vld [vmem:[%s2754_s3 + $0x60] sm:$0xff]   ;;  %v2079_v33 = vld [vmem:[%s2754_s3 + $0x68] sm:$0xff]  }
  0x7f   :  { %926 = vmatpush1.bf16.msra.mxu0 %v2053_v10  ;;  %1008 = vmatpush1.bf16.msra.mxu1 %v2056_v11  ;;  %v2072_v26 = vld [vmem:[%s2754_s3 + $0xd8] sm:$0xff]   ;;  %v2076_v30 = vld [vmem:[%s2754_s3 + $0xe0] sm:$0xff]   ;;  %v2080_v34 = vld [vmem:[%s2754_s3 + $0xe8] sm:$0xff]  }
  0x80   :  { %1761 = vmatprep.subr.bf16.mxu0 %v2059_v13  ;;  %1783 = vmatprep.subr.bf16.mxu1 %v2060_v14  ;;  %v2073_v27 = vld [vmem:[%s2754_s3 + $0x18] sm:$0xff]   ;;  %v2077_v31 = vld [vmem:[%s2754_s3 + $0x20] sm:$0xff]   ;;  %v2081_v35 = vld [vmem:[%s2754_s3 + $0x28] sm:$0xff]  }
  0x81   :  { %v2074_v28 = vld [vmem:[%s2754_s3 + $0x98] sm:$0xff]   ;;  %v2078_v32 = vld [vmem:[%s2754_s3 + $0xa0] sm:$0xff]   ;;  %v2082_v36 = vld [vmem:[%s2754_s3 + $0xa8] sm:$0xff]  }
  0x82   :  { %928 = vmatmul.mubr.bf16.vlgmr.msra.gmra.mrb[0].mxu0 %v208_v15  ;;  %1010 = vmatmul.mubr.bf16.vlgmr.msra.gmra.mrb[0].mxu1 %v208_v15  ;;  %v2083_v37 = vld [vmem:[%s2754_s3 + $0x70] sm:$0xff]   ;;  %v2087_v41 = vld [vmem:[%s2754_s3 + $0x78] sm:$0xff]   ;;  %v163_v49 = vld [vmem:[%s2753_s2] sm:$0xf] }
  0x83   :  { %1762 = vmatpush3.bf16.msra.mxu0 %v2061_v16  ;;  %1784 = vmatpush3.bf16.msra.mxu1 %v2062_v17  ;;  %v2084_v38 = vld [vmem:[%s2754_s3 + $0xf0] sm:$0xff]   ;;  %v2088_v42 = vld [vmem:[%s2754_s3 + $0xf8] sm:$0xff]   ;;  %v168_v52 = vrot.slane %v163_v49, %v167_v47  ;;  %v176_v53 = vrot.slane %v163_v49, %v175_v48  ;;  %v172_v54 = vrot.slane %v163_v49, %v171_v50  ;;  %v2091_v9 = vld [vmem:[%s2756_s5] sm:$0xff]  }
  0x84   :  { %1763 = vmatprep.subr.bf16.mxu0 %v2063_v18  ;;  %1785 = vmatprep.subr.bf16.mxu1 %v2064_v12  ;;  %v2085_v39 = vld [vmem:[%s2754_s3 + $0x30] sm:$0xff]   ;;  %v2089_v43 = vld [vmem:[%s2754_s3 + $0x38] sm:$0xff]   ;;  %v180_v55 = vrot.slane %v163_v49, %v179_v51  ;;  %v2092_v13 = vld [vmem:[%s2756_s5 + $0x8] sm:$0xff]  }
  0x85   :  { %v2086_v40 = vld [vmem:[%s2754_s3 + $0xb0] sm:$0xff]   ;;  %v2090_v44 = vld [vmem:[%s2754_s3 + $0xb8] sm:$0xff]   ;;  %v2095_v16 = vld [vmem:[%s2756_s5 + $0x20] sm:$0xff]  }
  0x86   :  { %v2093_v14 = vld [vmem:[%s2756_s5 + $0x10] sm:$0xff]   ;;  %v2094_v15 = vld [vmem:[%s2756_s5 + $0x18] sm:$0xff]   ;;  %v2096_v17 = vld [vmem:[%s2756_s5 + $0x28] sm:$0xff]  }
  0x87   :  { %1764 = vmatpush3.bf16.msra.mxu0 %v2065_v19  ;;  %1786 = vmatpush3.bf16.msra.mxu1 %v2066_v20  ;;  %v2097_v18 = vld [vmem:[%s2756_s5 + $0x30] sm:$0xff]   ;;  %v2098_v12 = vld [vmem:[%s2756_s5 + $0x38] sm:$0xff]   ;;  %v2099_v19 = vld [vmem:[%s2758_s7] sm:$0xff]  }
  0x88   :  { %1765 = vmatprep.subr.bf16.mxu0 %v2067_v21  ;;  %1787 = vmatprep.subr.bf16.mxu1 %v2068_v22  ;;  %v2100_v20 = vld [vmem:[%s2758_s7 + $0x8] sm:$0xff]  }
  0x8b   :  { %1766 = vmatpush3.bf16.msra.mxu0 %v2069_v23  ;;  %1788 = vmatpush3.bf16.msra.mxu1 %v2070_v24  ;;  %v1713_v23 = vld [vmem:[%s2755_s4] ss:$0 sm:$0xff] }
  0x8c   :  { %1767 = vmatprep.subr.bf16.mxu0 %v2071_v25  ;;  %1789 = vmatprep.subr.bf16.mxu1 %v2072_v26 }
  0x8f   :  { %1768 = vmatpush3.bf16.msra.mxu0 %v2073_v27  ;;  %1790 = vmatpush3.bf16.msra.mxu1 %v2074_v28 }
  0x90   :  { %1769 = vmatprep.subr.bf16.mxu0 %v2075_v29  ;;  %1791 = vmatprep.subr.bf16.mxu1 %v2076_v30 }
  0x93   :  { %1770 = vmatpush3.bf16.msra.mxu0 %v2077_v31  ;;  %1792 = vmatpush3.bf16.msra.mxu1 %v2078_v32 }
  0x94   :  { %1771 = vmatprep.subr.bf16.mxu0 %v2079_v33  ;;  %1793 = vmatprep.subr.bf16.mxu1 %v2080_v34 }
  0x97   :  { %1772 = vmatpush3.bf16.msra.mxu0 %v2081_v35  ;;  %1794 = vmatpush3.bf16.msra.mxu1 %v2082_v36  ;;  %v2101_v36 = vld [vmem:[%s2758_s7 + $0x10] sm:$0xff]  }
  0x98   :  { %1773 = vmatprep.subr.bf16.mxu0 %v2083_v37  ;;  %1795 = vmatprep.subr.bf16.mxu1 %v2084_v38  ;;  %v2102_v37 = vld [vmem:[%s2758_s7 + $0x18] sm:$0xff]   ;;  %v1746_v38 = vld [vmem:[%s2757_s6] ss:$0 sm:$0xff]  ;;  %s2130_s7 = smov [#allocation2]  }
  0x99   :  { %s1576_s0 = sshll.u32 %s2130_s7, 4  ;;  %s1577_s0 = int_to_ptr.vmem [resolvable:$true] %s1576_s0 }
  0x9a   :  { %s2103_s6 = scalar_lea.vmem %s1577_s0, 32  ;;  %p2108_p1 = scmp.lt.s32.totalorder %s1577_s0, %s1577_s0 }
  0x9b   :  { %1774 = vmatpush3.bf16.msra.mxu0 %v2085_v39  ;;  %1796 = vmatpush3.bf16.msra.mxu1 %v2086_v40  ;;  %p2104_p0 = scmp.ne.s32.totalorder %s1577_s0, %s2103_s6  ;;  %p2109_p2 = scmp.lt.s32.totalorder %s2103_s6, %s2103_s6 }
  0x9c   :  { %1775 = vmatprep.subr.bf16.mxu0 %v2087_v41  ;;  %1797 = vmatprep.subr.bf16.mxu1 %v2088_v42 }
  0x9d   :  { %p2110_p3 = por %p2109_p2, %p2108_p1 }
  0x9f   :  { %1776 = vmatpush3.bf16.msra.mxu0 %v2089_v43  ;;  %1798 = vmatpush3.bf16.msra.mxu1 %v2090_v44  ;;  %p2111_p4 = pnand %p2110_p3, %p2104_p0 }
  0xa0   :  { %1819 = vmatprep.subr.bf16.mxu0 %v2128_v46  ;;  %1839 = vmatprep.subr.bf16.mxu1 %v2128_v46 }
 0x155   :  { %v929_v56 = vpop.f32.mrb[0].mxu0  ;;  %v1011_v57 = vpop.f32.mrb[0].mxu1 }
 0x156   :  { %v1851_v58 = vadd.f32 %v929_v56, %v168_v52  ;;  %v1853_v59 = vadd.f32 %v1011_v57, %v176_v53  ;;  %v931_v60 = vpop.f32.mrb[1].mxu0  ;;  %v1013_v61 = vpop.f32.mrb[1].mxu1 }
 0x157   :  { %v1852_v62 = vadd.f32 %v931_v60, %v172_v54  ;;  %v1854_v63 = vadd.f32 %v1013_v61, %v180_v55  ;;  %v933_v0 = vpop.f32.mrb[2].mxu0  ;;  %v1015_v1 = vpop.f32.mrb[2].mxu1 }
 0x158   :  { %v1018_v2 = vmax.f32 %v1851_v58, 0.0  ;;  %v1020_v3 = vmax.f32 %v1853_v59, 0.0  ;;  %v934_v4 = vpop.f32.mrb[3].mxu0  ;;  %v1016_v5 = vpop.f32.mrb[3].mxu1 }
 0x159   :  { %v1019_v6 = vmax.f32 %v1852_v62, 0.0  ;;  %v1021_v45 = vmax.f32 %v1854_v63, 0.0 }
 0x15a   :  { %v1022_v10 = vpack.c.bf16 %v1018_v2, %v1018_v2  ;;  %v1024_v11 = vpack.c.bf16 %v1020_v3, %v1020_v3 }
 0x15b   :  { %v1023_v7 = vpack.c.bf16 %v1019_v6, %v1019_v6  ;;  %v1025_v8 = vpack.c.bf16 %v1021_v45, %v1021_v45 }
 0x15d   :  { %1321 = vmatprep.mubr.bf16.mxu0 %v1023_v7  ;;  %1361 = vmatprep.mubr.bf16.mxu1 %v1025_v8 }
 0x15e   :  { %1322 = vmatmul.mubr.bf16.vlgmr.msra.gmra.mrb[4].mxu0 %v1022_v10  ;;  %1362 = vmatmul.mubr.bf16.vlgmr.msra.gmra.mrb[4].mxu1 %v1024_v11 }
 0x15f   :  { %1820 = vmatpush3.bf16.msra.mxu0 %v2091_v9  ;;  %1835 = vmatprep.mubr.msk.bf16.mxu0 %vm2129_vm0, %v2128_v46 }
 0x160   :  { %1821 = vmatprep.subr.bf16.mxu0 %v2128_v46  ;;  %1847 = vmatprep.mubr.msk.bf16.mxu1 %vm2129_vm0, %v2128_v46 }
 0x161   :  { %1840 = vmatpush3.bf16.msra.mxu1 %v2099_v19 }
 0x162   :  { %1841 = vmatprep.subr.bf16.mxu1 %v2128_v46 }
 0x163   :  { %1822 = vmatpush3.bf16.msra.mxu0 %v2092_v13 }
 0x164   :  { %1823 = vmatprep.subr.bf16.mxu0 %v2128_v46 }
 0x165   :  { %1842 = vmatpush3.bf16.msra.mxu1 %v2100_v20 }
 0x166   :  { %1843 = vmatprep.subr.bf16.mxu1 %v2128_v46 }
 0x167   :  { %1824 = vmatpush3.bf16.msra.mxu0 %v2093_v14 }
 0x168   :  { %1825 = vmatprep.subr.bf16.mxu0 %v2128_v46 }
 0x169   :  { %1844 = vmatpush3.bf16.msra.mxu1 %v2101_v36 }
 0x16a   :  { %1845 = vmatprep.subr.bf16.mxu1 %v2128_v46 }
 0x16b   :  { %1826 = vmatpush3.bf16.msra.mxu0 %v2094_v15 }
 0x16c   :  { %1827 = vmatprep.subr.bf16.mxu0 %v2128_v46 }
 0x16d   :  { %1846 = vmatpush3.bf16.msra.mxu1 %v2102_v37 }
 0x16f   :  { %1828 = vmatpush3.bf16.msra.mxu0 %v2095_v16 }
 0x170   :  { %1829 = vmatprep.subr.bf16.mxu0 %v2128_v46 }
 0x173   :  { %1830 = vmatpush3.bf16.msra.mxu0 %v2096_v17 }
 0x174   :  { %1831 = vmatprep.subr.bf16.mxu0 %v2128_v46 }
 0x177   :  { %1832 = vmatpush3.bf16.msra.mxu0 %v2097_v18 }
 0x178   :  { %1833 = vmatprep.subr.bf16.mxu0 %v2128_v46  ;;  %v1755_v46 = vld [vmem:[%s2759_s8] ss:$0 sm:$0xff] }
 0x17b   :  { %1834 = vmatpush3.bf16.msra.mxu0 %v2098_v12 }
 0x231   :  { %v1777_v21 = vpop.f32.mrb[4].mxu0  ;;  %v1799_v22 = vpop.f32.mrb[4].mxu1 }
 0x232   :  { %v1778_v24 = vpop.f32.mrb[5].mxu0  ;;  %v1800_v25 = vpop.f32.mrb[5].mxu1 }
 0x233   :  { %v1779_v26 = vadd.f32 %v1778_v24, %v1777_v21  ;;  %v1801_v27 = vadd.f32 %v1800_v25, %v1799_v22  ;;  %v1780_v28 = vpop.f32.mrb[6].mxu0  ;;  %v1802_v29 = vpop.f32.mrb[6].mxu1 }
 0x234   :  { %v1781_v30 = vpop.f32.mrb[7].mxu0  ;;  %v1803_v31 = vpop.f32.mrb[7].mxu1 }
 0x235   :  { %v1324_v32 = vadd.f32 %v1779_v26, %v1713_v23 }
 0x237   :  { %v1364_v33 = vadd.f32 %v1801_v27, %v1324_v32 }
 0x239   :  { %v1369_v34 = vmax.f32 %v1364_v33, 0.0 }
 0x23b   :  { %v1370_v35 = vpack.c.bf16 %v1369_v34, %v1369_v34 }
 0x23d   :  { %1836 = vmatmul.mubr.bf16.vlgmr.msra.gmra.mrb[8].mxu0 %v1370_v35 }
 0x310   :  { %v1476_v39 = vpop.f32.mrb[8].mxu0 }
 0x311   :  { %v1477_v40 = vadd.f32 %v1746_v38, %v1476_v39  ;;  %v1837_v41 = vpop.f32.mrb[9].mxu0 }
 0x312   :  { %v1479_v42 = vpop.f32.mrb[10].mxu0 }
 0x313   :  { %v1482_v43 = vmax.f32 %v1477_v40, 0.0  ;;  %v1838_v44 = vpop.f32.mrb[11].mxu0 }
 0x315   :  { %v1483_v47 = vpack.c.bf16 %v1482_v43, %v1482_v43 }
 0x317   :  { %1848 = vmatmul.mubr.msk.bf16.vlgmr.msra.gmra.mrb[8].mxu1 %vm1523_vm1, %v1483_v47 }
 0x3ea   :  { %v1561_v48 = vpop.f32.mrb[8].mxu1 }
 0x3eb   :  { %v1562_v49 = vadd.f32 %v1755_v46, %v1561_v48  ;;  %v1849_v50 = vpop.f32.mrb[9].mxu1 }
 0x3ec   :  { %v1564_v51 = vpop.f32.mrb[10].mxu1 }
 0x3ed   :  { %v1567_v52 = vmax.f32 %v1562_v49, 0.0  ;;  %v1850_v53 = vpop.f32.mrb[11].mxu1 }
 0x3ef   :  { %1569 = vst.msk [vmem:[#allocation2] sm:$0x3] %vm1568_vm2, %v1567_v52 }
 0x3f0   :  { %2114 = shalt.err (!%p2111_p4)
}
 0x3f1   :  { %s2115_s28 = scalar_lea.hbm %s2760_s9, 32 }
 0x3f2   :  { %p2116_p5 = scmp.ne.s32.totalorder %s2760_s9, %s2115_s28  ;;  %p2119_p6 = scmp.lt.u32.totalorder %s2115_s28, %s2760_s9 }
 0x3f4   :  { %p2121_p7 = pnand %p2119_p6, %p2116_p5 }
 0x3f6   :  { %2124 = shalt.err (!%p2121_p7)
}
 0x3f7   :  { %1579 = dma.vmem_to_hbm [thread:$0]  %s1577_s0, 32, %s2760_s9, [#allocation3]  }
 0x3f8   :  { %2125 = dma.done.wait [#allocation3], 32  }
 0x3f9   :  { %2126 = vsyncadd [#allocation3], 4294967264 }
 0x3fa   :  { %1583 = vsyncpa [#allocation3], 1 }

</bundles_post_ra>
